<compile_context>
chip_gen: v7x
topology: tpu7x:2x2x1
jax: 0.10.0
libtpu: 0.0.40
codegen_flags: <defaults>
</compile_context>

<pallas_src>
import jax
import jax.numpy as jnp
import numpy as np
from jax.experimental import pallas as pl
from jax.experimental.pallas import tpu as pltpu

# --- model constants (mirrors YoloThreat / yolov5n6 Detect head after load_new_model) ---
PIXEL = 128                                       # YoloThreat.pixel
NL = 4                                            # detection levels (yolov5n6)
NA = 3                                            # anchors per level
NC = 1                                            # load_new_model sets nc = 1
NO = NC + 5                                       # outputs per anchor = 6
STRIDES = (8, 16, 32, 64)
GRIDS = tuple(PIXEL // s for s in STRIDES)        # (16, 8, 4, 2)
S_PER_LEVEL = tuple(g * g for g in GRIDS)         # (256, 64, 16, 4)
S_TOT = sum(S_PER_LEVEL)                          # 340
YOLO_PRED_COUNT = NA * S_TOT                      # 1020 == self.yolo_pred_count
CIN = (16, 32, 48, 64)                            # synthetic head-conv in_channels
C_TOT = sum(CIN)                                  # 160
D_OC = 2 * NA                                     # obj/cls columns kept per level
D_TOT = NL * D_OC                                 # 24
S_PAD = 384                                       # spatial/lane axis, padded to x128
K_PAD = 168                                       # 160 channels + 1 bias row, padded to x8
S_OFF = (0, 256, 320, 336)                        # lane offset of each level
C_OFF = (0, 16, 48, 96)                           # channel-row offset of each level
PRED_OFF = (0, 768, 960, 1008)                    # prediction-index offset of each level


# ----------------------------------------------------------------------------
# Fused Pallas kernel: block-diag head conv (obj/cls cols) + sigmoid + fc reduce
# ----------------------------------------------------------------------------
def fused_head_fc_kernel(f_ref, w_ref, g_ref, fcb_ref, out_ref):
    """Per-example: logit = fc_b + sum_{c,s} sigmoid(W_T @ F)[c,s] * g_t[c,s].

    f_ref  : (K_PAD, S_PAD)  packed channels-first features; per-level channel
                             rows carry data only in that level's lane slice,
                             row C_TOT is a constant-1 bias row, rest zero.
    w_ref  : (D_TOT, K_PAD)  block-diagonal transposed head weight (obj/cls
                             columns only) with the head bias in column C_TOT.
    g_ref  : (D_TOT, S_PAD)  fc weights scattered onto (6*l + 2*a + {obj,cls}, s);
                             collect() permutation + cat((obj,cls)) pre-baked,
                             zero on padded / cross-level entries.
    fcb_ref: (1, 1) SMEM     fc bias scalar.
    out_ref: (1, 1)          logit for this example.
    """
    # One lane-dense MXU pass covering all four levels (+ folded bias).
    raw = jnp.dot(w_ref[...], f_ref[...],
                  preferred_element_type=jnp.float32)        # (24, 384)
    sig = jax.nn.sigmoid(raw)                                 # EUP, ~9 dense vregs
    prod = sig * g_ref[...]                                   # VPU; g zeros kill padding
    total = jnp.sum(prod, axis=1, keepdims=True)              # (24, 1)
    total = jnp.sum(total, axis=0, keepdims=True)             # (1, 1)
    out_ref[...] = total + fcb_ref[0, 0]


def yolo_threat_logit(feat_slab, params):
    """Single pallas_call for the whole post-backbone forward path."""
    B = feat_slab.shape[0]
    out = pl.pallas_call(
        fused_head_fc_kernel,
        out_shape=jax.ShapeDtypeStruct((B, 1, 1), jnp.float32),
        grid=(B,),
        in_specs=[
            pl.BlockSpec((None, K_PAD, S_PAD), lambda b: (b, 0, 0)),   # features
            pl.BlockSpec((D_TOT, K_PAD), lambda b: (0, 0)),            # w_t (resident)
            pl.BlockSpec((D_TOT, S_PAD), lambda b: (0, 0)),            # g_t (resident)
            pl.BlockSpec(memory_space=pltpu.MemorySpace.SMEM),         # fc bias scalar
        ],
        out_specs=pl.BlockSpec((None, 1, 1), lambda b: (b, 0, 0)),
        compiler_params=pltpu.CompilerParams(
            dimension_semantics=("parallel",)),   # second TC on v7x; no-op v5e/v6e
    )(feat_slab, params["w_t"], params["g_t"], params["fc_b_s"])
    return out.reshape(B, 1)


# ----------------------------------------------------------------------------
# Glue / stand-in backbone / packing / parameter init
# ----------------------------------------------------------------------------
def stub_backbone(x, params):
    # TODO(synk): the pretrained YOLOv5n6 backbone/neck (torch.hub load) has no
    # clean Pallas equivalent here; replaced by a deterministic stand-in
    # (strided average pool + 1x1 projection + relu) producing the detect-head
    # input feature maps, channels-first: (B, Cin_l, S_l) with s = y*nx + x.
    B = x.shape[0]
    feats = []
    for l, st in enumerate(STRIDES):
        g = GRIDS[l]
        p = x.reshape(B, 3, g, st, g, st).mean(axis=(3, 5))           # (B, 3, g, g)
        p = p.reshape(B, 3, g * g)                                    # (B, 3, S)
        feats.append(jax.nn.relu(jnp.einsum("bcs,ck->bks", p, params["proj"][l])))
    return feats


def pack_features(feats):
    """Pack per-level channels-first maps into the kernel's block-diagonal
    (B, K_PAD, S_PAD) slab: levels stacked along channel rows, scattered along
    the padded lane axis, plus a constant-1 head-bias row (cheap XLA pads/concat)."""
    B = feats[0].shape[0]
    rows = []
    for l in range(NL):
        f = jnp.pad(feats[l], ((0, 0), (0, 0),
                               (S_OFF[l], S_PAD - S_OFF[l] - S_PER_LEVEL[l])))
        rows.append(f)
    rows.append(jnp.ones((B, 1, S_PAD), jnp.float32))                 # bias row
    rows.append(jnp.zeros((B, K_PAD - C_TOT - 1, S_PAD), jnp.float32))
    return jnp.concatenate(rows, axis=1)                              # (B, K_PAD, S_PAD)


def yolo_threat_forward(x, params):
    """Training-mode YoloThreat.forward (collect() path).

    The xy/wh decode of collect() only alters channels 0..3, which never feed
    the returned logit (forward() uses only channels 4 and 5), so the fused
    kernel skips it; the logit matches the full computation to fp32 tolerance
    (summation order differs from the reference matvec)."""
    if x.ndim == 3:
        x = x[None]
    feats = stub_backbone(x, params)
    return yolo_threat_logit(pack_features(feats), params)


def reference_forward(x, params):
    """Pure-JAX reference mirroring the full PyTorch forward (training path),
    including the complete collect() decode, for numerical validation."""
    if x.ndim == 3:
        x = x[None]
    feats = stub_backbone(x, params)
    zs = []
    for l in range(NL):
        raw = jnp.einsum("bks,kn->bsn", feats[l], params["head_w"][l]) + params["head_b"][l]
        B, S, _ = raw.shape
        g = GRIDS[l]
        r = raw.reshape(B, S, NA, NO).transpose(0, 2, 1, 3)           # (B, NA, S, NO)
        sig = jax.nn.sigmoid(r)
        yv, xv = jnp.meshgrid(jnp.arange(g, dtype=jnp.float32),
                              jnp.arange(g, dtype=jnp.float32), indexing="ij")
        g2 = jnp.stack([xv, yv], -1).reshape(1, 1, S, 2) - 0.5
        ag = params["anchors_px"][l].reshape(1, NA, 1, 2)
        xy = (sig[..., :2] * 2 + g2) * STRIDES[l]
        wh = (sig[..., 2:4] * 2) ** 2 * ag
        y = jnp.concatenate([xy, wh, sig[..., 4:]], axis=-1)
        zs.append(y.reshape(B, NA * S, NO))
    yolo_out = jnp.concatenate(zs, axis=1)                            # (B, 1020, 6)
    obj = yolo_out[:, :, 4]
    cls = yolo_out[:, :, 5]
    flat = jnp.concatenate([obj, cls], axis=-1)
    return flat @ params["fc_w"].T + params["fc_b"]


def init_params(key):
    ks = jax.random.split(key, 2 * NL + 2)
    # detect head convs: normal(0, 0.01) weight, zero bias (as in load_new_model)
    head_w = tuple(jax.random.normal(ks[l], (CIN[l], NA * NO), jnp.float32) * 0.01
                   for l in range(NL))
    head_b = tuple(jnp.zeros((1, NA * NO), jnp.float32) for _ in range(NL))
    proj = tuple(jax.random.normal(ks[NL + l], (3, CIN[l]), jnp.float32) * 0.1
                 for l in range(NL))
    # fc = nn.Linear(2*1020, 1)
    bound = 1.0 / float(2 * YOLO_PRED_COUNT) ** 0.5
    fc_w = jax.random.uniform(ks[2 * NL], (1, 2 * YOLO_PRED_COUNT), jnp.float32,
                              -bound, bound)
    fc_b = jax.random.uniform(ks[2 * NL + 1], (1,), jnp.float32, -bound, bound)
    # yolov5n6 pixel-space anchors (anchor_grid values) -- reference only
    anchors_px = jnp.array(
        [[[19., 27.], [44., 40.], [38., 94.]],
         [[96., 68.], [86., 152.], [180., 137.]],
         [[140., 301.], [303., 264.], [238., 542.]],
         [[436., 615.], [739., 380.], [925., 792.]]], jnp.float32)

    # ---- offline re-layout for the fused kernel (free at runtime) ----
    oc_cols = np.array([a * NO + o for a in range(NA) for o in (4, 5)], np.int32)
    head_w_np = [np.asarray(w) for w in head_w]
    head_b_np = [np.asarray(b).reshape(-1) for b in head_b]
    fc_w_np = np.asarray(fc_w)

    # Block-diagonal transposed head weight (obj/cls cols only) + folded bias col.
    w_t = np.zeros((D_TOT, K_PAD), np.float32)
    for l in range(NL):
        w_t[l * D_OC:(l + 1) * D_OC, C_OFF[l]:C_OFF[l] + CIN[l]] = head_w_np[l][:, oc_cols].T
        w_t[l * D_OC:(l + 1) * D_OC, C_TOT] = head_b_np[l][oc_cols]

    # fc weights scattered onto the kernel's (6*l + 2*a + {obj,cls}, lane) layout,
    # baking in collect()'s view/permute and the cat((objectness, class_probs)).
    g_t = np.zeros((D_TOT, S_PAD), np.float32)
    for l in range(NL):
        S = S_PER_LEVEL[l]
        for a in range(NA):
            idx = PRED_OFF[l] + a * S + np.arange(S)
            g_t[l * D_OC + 2 * a + 0, S_OFF[l]:S_OFF[l] + S] = fc_w_np[0, idx]                    # obj
            g_t[l * D_OC + 2 * a + 1, S_OFF[l]:S_OFF[l] + S] = fc_w_np[0, YOLO_PRED_COUNT + idx]  # cls

    return dict(head_w=head_w, head_b=head_b, proj=proj,
                fc_w=fc_w, fc_b=fc_b, anchors_px=anchors_px,
                w_t=jnp.asarray(w_t), g_t=jnp.asarray(g_t),
                fc_b_s=fc_b.reshape(1, 1))


if __name__ == "__main__":
    key = jax.random.PRNGKey(0)
    kx, kp = jax.random.split(key)
    params = init_params(kp)

    x = jax.random.normal(kx, (2, 3, PIXEL, PIXEL), jnp.float32)  # NCHW image batch

    fwd = jax.jit(lambda xx: yolo_threat_forward(xx, params))
    logit = jax.block_until_ready(fwd(x))
    assert logit.shape == (2, 1)

    ref = reference_forward(x, params)
    np.testing.assert_allclose(np.asarray(logit), np.asarray(ref),
                               rtol=1e-4, atol=1e-4)
    print("KERNEL_OK")
</pallas_src>

<mosaic_0001>
module attributes {stable_mosaic.version = 11 : i64} {
  func.func @fused_head_fc_kernel(%arg0: i32, %arg1: memref<1x168x384xf32, #tpu.memory_space<vmem>>, %arg2: memref<24x168xf32, #tpu.memory_space<vmem>>, %arg3: memref<24x384xf32, #tpu.memory_space<vmem>>, %arg4: memref<1x1xf32, #tpu.memory_space<smem>>, %arg5: memref<1x1x1xf32, #tpu.memory_space<vmem>>) attributes {dimension_semantics = [#tpu.dimension_semantics<parallel>], iteration_bounds = array<i64: 2>, scalar_prefetch = 0 : i64, scratch_operands = 0 : i64, tpu.core_type = #tpu.core_type<tc>, window_params = [{transform_indices = @transform_0, window_bounds = array<i64: 1, 168, 384>}, {pipeline_mode = #tpu.pipeline_mode<synchronous>, transform_indices = @transform_1, window_bounds = array<i64: 24, 168>}, {pipeline_mode = #tpu.pipeline_mode<synchronous>, transform_indices = @transform_2, window_bounds = array<i64: 24, 384>}, {transform_indices = @transform_3, window_bounds = array<i64: 1, 1>}, {transform_indices = @transform_4, window_bounds = array<i64: 1, 1, 1>}]} {
    %c0 = arith.constant 0 : index
    %c0_0 = arith.constant 0 : index
    %0 = vector.load %arg2[%c0, %c0_0] : memref<24x168xf32, #tpu.memory_space<vmem>>, vector<24x168xf32>
    %c0_1 = arith.constant 0 : index
    %c0_2 = arith.constant 0 : index
    %c0_3 = arith.constant 0 : index
    %1 = vector.load %arg1[%c0_1, %c0_2, %c0_3] : memref<1x168x384xf32, #tpu.memory_space<vmem>>, vector<1x168x384xf32>
    %2 = vector.shape_cast %1 : vector<1x168x384xf32> to vector<168x384xf32>
    %cst = arith.constant dense<0.000000e+00> : vector<24x384xf32>
    %3 = tpu.matmul %0, %2, %cst {dimension_numbers = #tpu.dot_dimension_numbers<[1], [0], [0], [1], [0, 0, 1, 1], [], []>} : vector<24x168xf32>, vector<168x384xf32>, vector<24x384xf32> -> vector<24x384xf32>
    %4 = arith.negf %3 : vector<24x384xf32>
    %5 = math.exp %4 : vector<24x384xf32>
    %cst_4 = arith.constant 1.000000e+00 : f32
    %6 = vector.broadcast %cst_4 : f32 to vector<24x384xf32>
    %7 = arith.addf %6, %5 : vector<24x384xf32>
    %8 = arith.divf %6, %7 : vector<24x384xf32>
    %c0_5 = arith.constant 0 : index
    %c0_6 = arith.constant 0 : index
    %9 = vector.load %arg3[%c0_5, %c0_6] : memref<24x384xf32, #tpu.memory_space<vmem>>, vector<24x384xf32>
    %10 = arith.mulf %8, %9 : vector<24x384xf32>
    %cst_7 = arith.constant dense<0.000000e+00> : vector<24xf32>
    %11 = vector.multi_reduction <add>, %10, %cst_7 [1] : vector<24x384xf32> to vector<24xf32>
    %12 = vector.shape_cast %11 : vector<24xf32> to vector<24x1xf32>
    %cst_8 = arith.constant dense<0.000000e+00> : vector<1xf32>
    %13 = vector.multi_reduction <add>, %12, %cst_8 [0] : vector<24x1xf32> to vector<1xf32>
    %14 = vector.shape_cast %13 : vector<1xf32> to vector<1x1xf32>
    %c0_9 = arith.constant 0 : index
    %c0_10 = arith.constant 0 : index
    %15 = memref.load %arg4[%c0_9, %c0_10] : memref<1x1xf32, #tpu.memory_space<smem>>
    %16 = vector.broadcast %15 : f32 to vector<1x1xf32>
    %17 = arith.addf %14, %16 : vector<1x1xf32>
    %c0_11 = arith.constant 0 : index
    %c0_12 = arith.constant 0 : index
    %c0_13 = arith.constant 0 : index
    %18 = vector.load %arg5[%c0_11, %c0_12, %c0_13] : memref<1x1x1xf32, #tpu.memory_space<vmem>>, vector<1x1x1xf32>
    %19 = vector.shape_cast %18 : vector<1x1x1xf32> to vector<1x1xf32>
    %20 = vector.shape_cast %17 : vector<1x1xf32> to vector<1x1x1xf32>
    tpu.vector_store %arg5[%c0_11, %c0_12, %c0_13], %20 {strides = array<i32>} : memref<1x1x1xf32, #tpu.memory_space<vmem>>, vector<1x1x1xf32>,
    return
  }
  func.func @transform_0(%arg0: i32) -> (i32, i32, i32) {
    %c0_i32 = arith.constant 0 : i32
    %c0_i32_0 = arith.constant 0 : i32
    %c0_i32_1 = arith.constant 0 : i32
    return %arg0, %c0_i32, %c0_i32_0 : i32, i32, i32
  }
  func.func @transform_1(%arg0: i32) -> (i32, i32) {
    %c0_i32 = arith.constant 0 : i32
    %c0_i32_0 = arith.constant 0 : i32
    %c0_i32_1 = arith.constant 0 : i32
    return %c0_i32, %c0_i32_0 : i32, i32
  }
  func.func @transform_2(%arg0: i32) -> (i32, i32) {
    %c0_i32 = arith.constant 0 : i32
    %c0_i32_0 = arith.constant 0 : i32
    %c0_i32_1 = arith.constant 0 : i32
    return %c0_i32, %c0_i32_0 : i32, i32
  }
  func.func @transform_3(%arg0: i32) -> (i32, i32) {
    %c0_i32 = arith.constant 0 : i32
    %c0_i32_0 = arith.constant 0 : i32
    %c0_i32_1 = arith.constant 0 : i32
    return %c0_i32, %c0_i32_0 : i32, i32
  }
  func.func @transform_4(%arg0: i32) -> (i32, i32, i32) {
    %c0_i32 = arith.constant 0 : i32
    %c0_i32_0 = arith.constant 0 : i32
    %c0_i32_1 = arith.constant 0 : i32
    return %arg0, %c0_i32, %c0_i32_0 : i32, i32, i32
  }
}

</mosaic_0001>

<bundles_post_ra>
// kernel: _lambda_.1
= control target key start
LH: loop header
LB: loop body
LE: loop exit
PB: predicated region body
PF: predicated region fallthrough
CT: control target
= control target key end

     0   :  { %s759_s17 = smov 0   ;;  %s906_s0 = inlined_call_operand.vmem [shape: f32[2,168,384], index: 0, kind: input, shape index: {}]   ;;  %s907_s1 = inlined_call_operand.vmem [shape: f32[24,168], index: 1, kind: input, shape index: {}]   ;;  %s908_s2 = inlined_call_operand.vmem [shape: f32[24,384], index: 2, kind: input, shape index: {}]   ;;  %s909_s3 = inlined_call_operand.<no memory space> [shape: f32[1,1], index: 3, kind: input, shape index: {}]   ;;  %s910_s4 = inlined_call_operand.vmem [shape: f32[2,1,1], index: 4, kind: output, shape index: {}]  }
   0x1   :  { %9 = sst [smem:[#allocation2]] %s909_s3 }
   0x2 LB: > { %s581_s18 = sadd.s32 4294967295, %s727_s17   ;;  %p585_p0 = scmp.ge.s32.totalorder %s727_s17, 1  ;;  %s727_s17 = sphi %s759_s17, %s15_s17  }
   0x3   : > { %p163_p1 = scmp.lt.s32.totalorder %s727_s17, 3 }
   0x5   : > { %p164_p2 = pnand %p585_p0, %p163_p1 }
   0x6   : > { %p187_p3 = scmp.lt.s32.totalorder (!%p164_p2), %s581_s18, 1  ;;  %v196_v0 = vld [vmem:[%s907_s1 + $0x8] sm:$0xff] (!%p164_p2)  ;;  %vm264_vm0 = vcmask (!%p164_p2), 326656   ;;  %v729_v1 = vmov (!%p164_p2), 0.0|0.0   ;;  %s529_s27 = sld [smem:[#allocation2]] (!%p164_p2)  ;;  %vm532_vm1 = vcmask (!%p164_p2), 0  }
   0x7   : > { %167 = sbr.rel (%p164_p2) target bundleno = 475 (0x1db), region = 36  ;;  %644 = vmatprep.subr.bf16.mxu1 (!%p164_p2), %v729_v1  ;;  %587 = vmatprep.mubr.msk.f32.mxu0 (!%p164_p2), %vm264_vm0, %v196_v0 }
   0x8   : > { %590 = vmatprep.mubr.msk.f32.mxu1 (!%p164_p2), %vm264_vm0, %v196_v0 }
   0xe   : > { %s912_s18 = smov (!%p187_p3, %s581_s18), 1 }
   0xf   : > { %s674_s3 = smul.u32 504, %s912_s18  ;;  %s194_s30 = scalar_lea.vmem %s910_s4, %s912_s18 }
  0x11   : > { %s779_s23 = scalar_lea.vmem %s906_s0, %s674_s3 }
  0x12   : > { %v202_v2 = vld [vmem:[%s779_s23 + $0x8] sm:$0xff]  ;;  %v205_v3 = vld [vmem:[%s779_s23 + $0x20] sm:$0xff]  ;;  %v204_v6 = vld [vmem:[%s779_s23 + $0x18] sm:$0xff] }
  0x13   : > { %v201_v4 = vld [vmem:[%s779_s23] sm:$0xff]  ;;  %v604_v5 = vpack.c.bf16 %v205_v3, %v202_v2  ;;  %v203_v7 = vld [vmem:[%s779_s23 + $0x10] sm:$0xff]  ;;  %v206_v8 = vld [vmem:[%s779_s23 + $0x28] sm:$0xff] }
  0x14   : > { %v606_v9 = vpack.c.bf16 %v204_v6, %v201_v4  ;;  %v645_v10 = vpack.c.bf16 %v206_v8, %v203_v7  ;;  %v208_v11 = vld [vmem:[%s779_s23 + $0x38] sm:$0xff]  ;;  %v211_v12 = vld [vmem:[%s779_s23 + $0x50] sm:$0xff]  ;;  %v210_v15 = vld [vmem:[%s779_s23 + $0x48] sm:$0xff] }
  0x15   : > { %v207_v13 = vld [vmem:[%s779_s23 + $0x30] sm:$0xff]  ;;  %605 = vmatprep.subr.bf16.mxu0 %v604_v5  ;;  %v608_v14 = vpack.c.bf16 %v211_v12, %v208_v11  ;;  %v209_v16 = vld [vmem:[%s779_s23 + $0x40] sm:$0xff]  ;;  %v212_v17 = vld [vmem:[%s779_s23 + $0x58] sm:$0xff] }
  0x16   : > { %607 = vmatpush1.bf16.msra.mxu0 %v606_v9  ;;  %646 = vmatpush1.bf16.msra.mxu1 %v645_v10  ;;  %v610_v18 = vpack.c.bf16 %v210_v15, %v207_v13  ;;  %v648_v19 = vpack.c.bf16 %v212_v17, %v209_v16  ;;  %v214_v20 = vld [vmem:[%s779_s23 + $0x68] sm:$0xff]  ;;  %v217_v21 = vld [vmem:[%s779_s23 + $0x80] sm:$0xff]  ;;  %v216_v24 = vld [vmem:[%s779_s23 + $0x78] sm:$0xff] }
  0x17   : > { %v213_v22 = vld [vmem:[%s779_s23 + $0x60] sm:$0xff]  ;;  %609 = vmatprep.subr.bf16.mxu0 %v608_v14  ;;  %647 = vmatprep.subr.bf16.mxu1 %v729_v1  ;;  %v612_v23 = vpack.c.bf16 %v217_v21, %v214_v20  ;;  %v215_v25 = vld [vmem:[%s779_s23 + $0x70] sm:$0xff]  ;;  %v218_v26 = vld [vmem:[%s779_s23 + $0x88] sm:$0xff] }
  0x18   : > { %v220_v27 = vld [vmem:[%s779_s23 + $0x98] sm:$0xff]  ;;  %v223_v28 = vld [vmem:[%s779_s23 + $0xb0] sm:$0xff]  ;;  %v614_v29 = vpack.c.bf16 %v216_v24, %v213_v22  ;;  %v651_v30 = vpack.c.bf16 %v218_v26, %v215_v25  ;;  %v222_v33 = vld [vmem:[%s779_s23 + $0xa8] sm:$0xff] }
  0x19   : > { %v219_v31 = vld [vmem:[%s779_s23 + $0x90] sm:$0xff]  ;;  %v616_v32 = vpack.c.bf16 %v223_v28, %v220_v27  ;;  %v221_v34 = vld [vmem:[%s779_s23 + $0xa0] sm:$0xff]  ;;  %v224_v35 = vld [vmem:[%s779_s23 + $0xb8] sm:$0xff] }
  0x1a   : > { %611 = vmatpush1.bf16.msra.mxu0 %v610_v18  ;;  %649 = vmatpush1.bf16.msra.mxu1 %v648_v19  ;;  %v226_v36 = vld [vmem:[%s779_s23 + $0xc8] sm:$0xff]  ;;  %v229_v37 = vld [vmem:[%s779_s23 + $0xe0] sm:$0xff]  ;;  %v618_v38 = vpack.c.bf16 %v222_v33, %v219_v31  ;;  %v654_v39 = vpack.c.bf16 %v224_v35, %v221_v34  ;;  %v228_v42 = vld [vmem:[%s779_s23 + $0xd8] sm:$0xff]  ;;  %v730_v31 = vmov 0.0  }
  0x1b   : > { %613 = vmatprep.subr.bf16.mxu0 %v612_v23  ;;  %650 = vmatprep.subr.bf16.mxu1 %v729_v1  ;;  %v225_v40 = vld [vmem:[%s779_s23 + $0xc0] sm:$0xff]  ;;  %v620_v41 = vpack.c.bf16 %v229_v37, %v226_v36  ;;  %v227_v43 = vld [vmem:[%s779_s23 + $0xd0] sm:$0xff]  ;;  %v230_v44 = vld [vmem:[%s779_s23 + $0xe8] sm:$0xff] }
  0x1c   : > { %v232_v45 = vld [vmem:[%s779_s23 + $0xf8] sm:$0xff]  ;;  %v235_v46 = vld [vmem:[%s779_s23 + $0x110] sm:$0xff]  ;;  %v622_v47 = vpack.c.bf16 %v228_v42, %v225_v40  ;;  %v657_v48 = vpack.c.bf16 %v230_v44, %v227_v43  ;;  %v234_v51 = vld [vmem:[%s779_s23 + $0x108] sm:$0xff] }
  0x1d   : > { %v231_v49 = vld [vmem:[%s779_s23 + $0xf0] sm:$0xff]  ;;  %v624_v50 = vpack.c.bf16 %v235_v46, %v232_v45  ;;  %v233_v52 = vld [vmem:[%s779_s23 + $0x100] sm:$0xff]  ;;  %v236_v53 = vld [vmem:[%s779_s23 + $0x118] sm:$0xff] }
  0x1e   : > { %615 = vmatpush1.bf16.msra.mxu0 %v614_v29  ;;  %652 = vmatpush1.bf16.msra.mxu1 %v651_v30  ;;  %v238_v54 = vld [vmem:[%s779_s23 + $0x128] sm:$0xff]  ;;  %v241_v55 = vld [vmem:[%s779_s23 + $0x140] sm:$0xff]  ;;  %v626_v56 = vpack.c.bf16 %v234_v51, %v231_v49  ;;  %v660_v57 = vpack.c.bf16 %v236_v53, %v233_v52  ;;  %v240_v60 = vld [vmem:[%s779_s23 + $0x138] sm:$0xff] }
  0x1f   : > { %617 = vmatprep.subr.bf16.mxu0 %v616_v32  ;;  %653 = vmatprep.subr.bf16.mxu1 %v729_v1  ;;  %v237_v58 = vld [vmem:[%s779_s23 + $0x120] sm:$0xff]  ;;  %v628_v59 = vpack.c.bf16 %v241_v55, %v238_v54  ;;  %v239_v61 = vld [vmem:[%s779_s23 + $0x130] sm:$0xff]  ;;  %v242_v62 = vld [vmem:[%s779_s23 + $0x148] sm:$0xff] }
  0x20   : > { %v244_v63 = vld [vmem:[%s779_s23 + $0x158] sm:$0xff]  ;;  %v247_v0 = vld [vmem:[%s779_s23 + $0x170] sm:$0xff]  ;;  %v630_v2 = vpack.c.bf16 %v240_v60, %v237_v58  ;;  %v663_v3 = vpack.c.bf16 %v242_v62, %v239_v61  ;;  %v246_v6 = vld [vmem:[%s779_s23 + $0x168] sm:$0xff] }
  0x21   : > { %v243_v4 = vld [vmem:[%s779_s23 + $0x150] sm:$0xff]  ;;  %v632_v5 = vpack.c.bf16 %v247_v0, %v244_v63  ;;  %v245_v7 = vld [vmem:[%s779_s23 + $0x160] sm:$0xff]  ;;  %v248_v8 = vld [vmem:[%s779_s23 + $0x178] sm:$0xff] }
  0x22   : > { %619 = vmatpush1.bf16.msra.mxu0 %v618_v38  ;;  %655 = vmatpush1.bf16.msra.mxu1 %v654_v39  ;;  %v250_v9 = vld [vmem:[%s779_s23 + $0x188] sm:$0xff]  ;;  %v253_v10 = vld [vmem:[%s779_s23 + $0x1a0] sm:$0xff]  ;;  %v634_v11 = vpack.c.bf16 %v246_v6, %v243_v4  ;;  %v666_v12 = vpack.c.bf16 %v248_v8, %v245_v7  ;;  %v252_v15 = vld [vmem:[%s779_s23 + $0x198] sm:$0xff] }
  0x23   : > { %621 = vmatprep.subr.bf16.mxu0 %v620_v41  ;;  %656 = vmatprep.subr.bf16.mxu1 %v729_v1  ;;  %v249_v13 = vld [vmem:[%s779_s23 + $0x180] sm:$0xff]  ;;  %v636_v14 = vpack.c.bf16 %v253_v10, %v250_v9  ;;  %v251_v16 = vld [vmem:[%s779_s23 + $0x190] sm:$0xff]  ;;  %v254_v17 = vld [vmem:[%s779_s23 + $0x1a8] sm:$0xff] }
  0x24   : > { %v256_v18 = vld [vmem:[%s779_s23 + $0x1b8] sm:$0xff]  ;;  %v259_v19 = vld [vmem:[%s779_s23 + $0x1d0] sm:$0xff]  ;;  %v638_v20 = vpack.c.bf16 %v252_v15, %v249_v13  ;;  %v669_v21 = vpack.c.bf16 %v254_v17, %v251_v16  ;;  %v258_v24 = vld [vmem:[%s779_s23 + $0x1c8] sm:$0xff] }
  0x25   : > { %v255_v22 = vld [vmem:[%s779_s23 + $0x1b0] sm:$0xff]  ;;  %v640_v23 = vpack.c.bf16 %v259_v19, %v256_v18  ;;  %v257_v25 = vld [vmem:[%s779_s23 + $0x1c0] sm:$0xff]  ;;  %v260_v26 = vld [vmem:[%s779_s23 + $0x1d8] sm:$0xff] }
  0x26   : > { %623 = vmatpush1.bf16.msra.mxu0 %v622_v47  ;;  %658 = vmatpush1.bf16.msra.mxu1 %v657_v48  ;;  %v642_v27 = vpack.c.bf16 %v258_v24, %v255_v22  ;;  %v672_v28 = vpack.c.bf16 %v260_v26, %v257_v25  ;;  %v262_v29 = vld [vmem:[%s779_s23 + $0x1e8] sm:$0xff]  ;;  %v261_v30 = vld [vmem:[%s779_s23 + $0x1e0] sm:$0xff]  ;;  %v263_v32 = vld [vmem:[%s779_s23 + $0x1f0] sm:$0xff] }
  0x27   : > { %625 = vmatprep.subr.bf16.mxu0 %v624_v50  ;;  %659 = vmatprep.subr.bf16.mxu1 %v729_v1  ;;  %v195_v33 = vld [vmem:[%s907_s1] sm:$0xff]  ;;  %v198_v34 = vld [vmem:[%s907_s1 + $0x18] sm:$0xff]  ;;  %v200_v35 = vld [vmem:[%s907_s1 + $0x28] sm:$0xff] }
  0x28   : > { %v199_v36 = vld [vmem:[%s907_s1 + $0x20] sm:$0xff]  ;;  %v493_v16 = vld [vmem:[%s908_s2 + $0x10] sm:$0xff]  ;;  %v496_v26 = vld [vmem:[%s908_s2 + $0x28] sm:$0xff] }
  0x29   : > { %v491_v13 = vld [vmem:[%s908_s2] sm:$0xff] }
  0x2a   : > { %627 = vmatpush1.bf16.msra.mxu0 %v626_v56  ;;  %661 = vmatpush1.bf16.msra.mxu1 %v660_v57 }
  0x2b   : > { %629 = vmatprep.subr.bf16.mxu0 %v628_v59  ;;  %662 = vmatprep.subr.bf16.mxu1 %v729_v1 }
  0x2e   : > { %631 = vmatpush1.bf16.msra.mxu0 %v630_v2  ;;  %664 = vmatpush1.bf16.msra.mxu1 %v663_v3 }
  0x2f   : > { %633 = vmatprep.subr.bf16.mxu0 %v632_v5  ;;  %665 = vmatprep.subr.bf16.mxu1 %v729_v1 }
  0x32   : > { %635 = vmatpush1.bf16.msra.mxu0 %v634_v11  ;;  %667 = vmatpush1.bf16.msra.mxu1 %v666_v12 }
  0x33   : > { %637 = vmatprep.subr.bf16.mxu0 %v636_v14  ;;  %668 = vmatprep.subr.bf16.mxu1 %v729_v1  ;;  %v492_v14 = vld [vmem:[%s908_s2 + $0x8] sm:$0xff] }
  0x36   : > { %639 = vmatpush1.bf16.msra.mxu0 %v638_v20  ;;  %670 = vmatpush1.bf16.msra.mxu1 %v669_v21  ;;  %v494_v21 = vld [vmem:[%s908_s2 + $0x18] sm:$0xff] }
  0x37   : > { %641 = vmatprep.subr.bf16.mxu0 %v640_v23  ;;  %671 = vmatprep.subr.bf16.mxu1 %v729_v1  ;;  %v197_v1 = vld [vmem:[%s907_s1 + $0x10] sm:$0xff]  ;;  %v495_v23 = vld [vmem:[%s908_s2 + $0x20] sm:$0xff] }
  0x3a   : > { %643 = vmatpush1.bf16.msra.mxu0 %v642_v27  ;;  %673 = vmatpush1.bf16.msra.mxu1 %v672_v28 }
  0x3b   : > { %314 = vmatprep.subr.mxu0 %v262_v29  ;;  %397 = vmatprep.subr.mxu1 %v730_v31 }
  0x3e   : > { %315 = vmatpush1.msra.mxu0 %v261_v30  ;;  %398 = vmatpush1.msra.mxu1 %v263_v32  ;;  %v497_v32 = vld [vmem:[%s908_s2 + $0x30] sm:$0xff] }
  0x3f   : > { %339 = vmatmul.mubr.f32.vlgmr.msra.gmra.mrb[0].mxu0 %v195_v33  ;;  %422 = vmatmul.mubr.f32.vlgmr.msra.gmra.mrb[0].mxu1 %v195_v33 }
  0x40   : > { %588 = vmatprep.mubr.msk.f32.mxu0 %vm264_vm0, %v198_v34  ;;  %591 = vmatprep.mubr.msk.f32.mxu1 %vm264_vm0, %v198_v34  ;;  %v498_v34 = vld [vmem:[%s908_s2 + $0x38] sm:$0xff] }
  0x43   : > { %345 = vmatmul.mubr.f32.gmra.mrb[2].mxu0 %v197_v1  ;;  %427 = vmatmul.mubr.f32.gmra.mrb[2].mxu1 %v197_v1 }
  0x44   : > { %589 = vmatprep.mubr.msk.f32.mxu0 %vm264_vm0, %v200_v35  ;;  %592 = vmatprep.mubr.msk.f32.mxu1 %vm264_vm0, %v200_v35 }
  0x47   : > { %351 = vmatmul.mubr.f32.gmra.mrb[4].mxu0 %v199_v36  ;;  %432 = vmatmul.mubr.f32.gmra.mrb[4].mxu1 %v199_v36  ;;  %v499_v36 = vld [vmem:[%s908_s2 + $0x40] sm:$0xff] }
 0x112   : > { %v340_v37 = vpop.f32.mrb[0].mxu0  ;;  %v423_v38 = vpop.f32.mrb[0].mxu1 }
 0x113   : > { %v593_v39 = vmul.f32 -1.442695, %v340_v37  ;;  %v342_v40 = vpop.f32.mrb[1].mxu0  ;;  %v595_v41 = vmul.f32 -1.442695, %v423_v38  ;;  %v425_v42 = vpop.f32.mrb[1].mxu1 }
 0x114   : > { %v594_v43 = vmul.f32 -1.442695, %v342_v40 }
 0x115   : > { %685 = vpow2.f32 %v593_v39 }
 0x116   : > { %687 = vpow2.f32 %v594_v43  ;;  %v346_v44 = vpop.f32.mrb[2].mxu0  ;;  %v428_v45 = vpop.f32.mrb[2].mxu1 }
 0x117   : > { %689 = vpow2.f32 %v595_v41  ;;  %v596_v46 = vmul.f32 -1.442695, %v346_v44  ;;  %v348_v47 = vpop.f32.mrb[3].mxu0  ;;  %v598_v48 = vmul.f32 -1.442695, %v428_v45  ;;  %v430_v49 = vpop.f32.mrb[3].mxu1 }
 0x118   : > { %v597_v50 = vmul.f32 -1.442695, %v348_v47 }
 0x119   : > { %691 = vpow2.f32 %v596_v46 }
 0x11a   : > { %693 = vpow2.f32 %v597_v50  ;;  %v352_v51 = vpop.f32.mrb[4].mxu0  ;;  %v433_v52 = vpop.f32.mrb[4].mxu1 }
 0x11b   : > { %695 = vpow2.f32 %v598_v48  ;;  %v599_v53 = vmul.f32 -1.442695, %v352_v51  ;;  %v354_v54 = vpop.f32.mrb[5].mxu0  ;;  %v601_v55 = vmul.f32 -1.442695, %v433_v52  ;;  %v435_v56 = vpop.f32.mrb[5].mxu1 }
 0x11c   : > { %v600_v57 = vmul.f32 -1.442695, %v354_v54 }
 0x11d   : > { %697 = vpow2.f32 %v599_v53 }
 0x11e   : > { %699 = vpow2.f32 %v600_v57 }
 0x11f   : > { %v686_v58 = vpop.eup %685  ;;  %701 = vpow2.f32 %v601_v55  ;;  %v530_v55 = vstv %s529_s27 }
 0x120   : > { %v688_v59 = vpop.eup %687  ;;  %v464_v60 = vadd.f32 1.0, %v686_v58 }
 0x121   : > { %v690_v61 = vpop.eup %689  ;;  %v465_v62 = vadd.f32 1.0, %v688_v59 }
 0x122   : > { %703 = vrcp.f32 %v464_v60  ;;  %v466_v63 = vadd.f32 1.0, %v690_v61 }
 0x123   : > { %v692_v0 = vpop.eup %691  ;;  %705 = vrcp.f32 %v465_v62 }
 0x124   : > { %v694_v2 = vpop.eup %693  ;;  %707 = vrcp.f32 %v466_v63  ;;  %v467_v3 = vadd.f32 1.0, %v692_v0 }
 0x125   : > { %v696_v4 = vpop.eup %695  ;;  %v468_v5 = vadd.f32 1.0, %v694_v2 }
 0x126   : > { %709 = vrcp.f32 %v467_v3  ;;  %v469_v6 = vadd.f32 1.0, %v696_v4 }
 0x127   : > { %v698_v7 = vpop.eup %697  ;;  %711 = vrcp.f32 %v468_v5 }
 0x128   : > { %v700_v8 = vpop.eup %699  ;;  %713 = vrcp.f32 %v469_v6  ;;  %v470_v9 = vadd.f32 1.0, %v698_v7 }
 0x129   : > { %v702_v10 = vpop.eup %701  ;;  %v471_v11 = vadd.f32 1.0, %v700_v8 }
 0x12a   : > { %715 = vrcp.f32 %v470_v9  ;;  %v472_v12 = vadd.f32 1.0, %v702_v10 }
 0x12b   : > { %717 = vrcp.f32 %v471_v11 }
 0x12c   : > { %v704_v15 = vpop.eup %703  ;;  %719 = vrcp.f32 %v472_v12 }
 0x12d   : > { %v706_v17 = vpop.eup %705  ;;  %v500_v18 = vmul.f32 %v704_v15, %v491_v13 }
 0x12e   : > { %v708_v19 = vpop.eup %707  ;;  %v501_v20 = vmul.f32 %v706_v17, %v492_v14 }
 0x12f   : > { %v502_v22 = vmul.f32 %v708_v19, %v493_v16 }
 0x130   : > { %v710_v24 = vpop.eup %709  ;;  %v509_v25 = vadd.f32 %v501_v20, %v500_v18 }
 0x131   : > { %v712_v27 = vpop.eup %711  ;;  %v503_v28 = vmul.f32 %v710_v24, %v494_v21 }
 0x132   : > { %v714_v29 = vpop.eup %713  ;;  %v510_v30 = vadd.f32 %v509_v25, %v502_v22  ;;  %v504_v31 = vmul.f32 %v712_v27, %v495_v23 }
 0x133   : > { %v505_v33 = vmul.f32 %v714_v29, %v496_v26 }
 0x134   : > { %v716_v1 = vpop.eup %715  ;;  %511 = vadd.xlane.f32.xlu0 %v510_v30  ;;  %v513_v35 = vadd.f32 %v504_v31, %v503_v28 }
 0x135   : > { %v718_v37 = vpop.eup %717  ;;  %v506_v38 = vmul.f32 %v716_v1, %v497_v32 }
 0x136   : > { %v720_v39 = vpop.eup %719  ;;  %v514_v40 = vadd.f32 %v513_v35, %v505_v33  ;;  %v507_v41 = vmul.f32 %v718_v37, %v498_v34 }
 0x137   : > { %v508_v42 = vmul.f32 %v720_v39, %v499_v36 }
 0x138   : > { %515 = vadd.xlane.f32.xlu0 %v514_v40  ;;  %v517_v43 = vadd.f32 %v507_v41, %v506_v38 }
 0x13a   : > { %v518_v44 = vadd.f32 %v517_v43, %v508_v42 }
 0x13c   : > { %519 = vadd.xlane.f32.xlu1 %v518_v44 }
 0x1c1   : > { %v512_v45 = vpop.xlane.xlu0 %511 }
 0x1c5   : > { %v516_v46 = vpop.xlane.xlu0 %515 }
 0x1c6   : > { %v521_v47 = vadd.f32 %v516_v46, %v512_v45 }
 0x1c9   : > { %v520_v48 = vpop.xlane.xlu1 %519 }
 0x1ca   : > { %v522_v49 = vadd.f32 %v521_v47, %v520_v48 }
 0x1cc   : > { %v523_v50 = vrot.slane %v522_v49, 4 }
 0x1ce   : > { %v524_v51 = vadd.f32 %v523_v50, %v522_v49 }
 0x1d0   : > { %v525_v52 = vrot.slane %v524_v51, 2 }
 0x1d2   : > { %v526_v53 = vadd.f32 %v525_v52, %v524_v51 }
 0x1d4   : > { %v527_v54 = vrot.slane %v526_v53, 1 }
 0x1d6   : > { %v528_v56 = vadd.f32 %v527_v54, %v526_v53 }
 0x1d8   : > { %v531_v57 = vadd.f32 %v530_v55, %v528_v56 }
 0x1da   : > { %533 = vst.msk [vmem:[%s194_s30] sm:$0x1] %vm532_vm1, %v531_v57 }
 0x1db PF: > { %s15_s17 = sadd.s32 1, %s727_s17  }
 0x1dc   : > { %p12_p4 = scmp.ge.s32.totalorder %s15_s17, 4  }
 0x1de   :  { %14 = sbr.rel (!%p12_p4) target bundleno = 2 (0x2), region = 66 }

</bundles_post_ra>
